<compile_context>
chip_gen: v5e
topology: v5e:2x2
jax: 0.10.0
libtpu: 0.0.40
codegen_flags: <defaults>
</compile_context>

<pallas_src>
import functools
import math

import jax
import jax.numpy as jnp
from jax.experimental import pallas as pl
from jax.experimental.pallas import tpu as pltpu


# ----------------------------------------------------------------------------
# Pallas kernel: chunk-parallel scan.
#   s_flat = u_flat @ M + carry @ P          (one big MXU matmul per chunk)
#   carry  = s[last valid step]              (only serial dependency)
#   y_t    = s_t @ C^T                       (independent per-step dots)
# ----------------------------------------------------------------------------
def ssm_scan_kernel(init_state_ref, u_ref, m_ref, p_ref, ct_ref,
                    out_ref, final_state_ref,
                    state_scratch, s_scratch,
                    *, t_chunk, state_dim, tail_idx):
    c = pl.program_id(1)
    last_c = pl.num_programs(1) - 1

    # New batch block starts at chunk 0: (re)load the carried state.
    @pl.when(c == 0)
    def _():
        state_scratch[...] = init_state_ref[...]

    carry = state_scratch[...]                                   # (bb, S) f32

    # All intra-chunk states from one large matmul against the block-Toeplitz
    # causal mixing matrix, plus the (tiny) cross-chunk carry contribution.
    s_flat = (
        jnp.dot(u_ref[...], m_ref[...], preferred_element_type=jnp.float32)
        + jnp.dot(carry, p_ref[...], preferred_element_type=jnp.float32)
    )                                                            # (bb, T*S) f32
    s_scratch[...] = s_flat                                      # one lane-dense store

    # Cross-chunk carry: only the (bb, S) state is serial.  With zero-padded u the
    # true final state of a ragged last chunk sits at tail_idx (a static index),
    # handled once per chunk under pl.when (nothing on a per-step chain).
    last_lo = (t_chunk - 1) * state_dim
    if tail_idx is None or tail_idx == t_chunk - 1:
        state_scratch[...] = s_scratch[:, last_lo:last_lo + state_dim]
    else:
        tail_lo = tail_idx * state_dim

        @pl.when(c == last_c)
        def _():
            state_scratch[...] = s_scratch[:, tail_lo:tail_lo + state_dim]

        @pl.when(c != last_c)
        def _():
            state_scratch[...] = s_scratch[:, last_lo:last_lo + state_dim]

    # Output projection: T independent (pipelined) dots, each storing a full
    # hidden-wide row slab (lane-dense for hidden >= 128).  The 16-lane reads of
    # s_scratch are cheap loads, not masked stores.
    ct = ct_ref[...]
    for t in range(t_chunk):
        s_t = s_scratch[:, t * state_dim:(t + 1) * state_dim].astype(ct.dtype)
        y_t = jnp.dot(s_t, ct, preferred_element_type=jnp.float32)
        out_ref[:, t, :] = y_t.astype(out_ref.dtype)

    # Only the last chunk writes the final state (block is VMEM-resident over c).
    @pl.when(c == last_c)
    def _():
        final_state_ref[...] = state_scratch[...]


# ----------------------------------------------------------------------------
# Wrapper helpers
# ----------------------------------------------------------------------------
def _tensorcores_per_chip():
    """Best-effort detection of multi-TensorCore chips (v7x-class)."""
    try:
        kind = jax.devices()[0].device_kind.lower()
    except Exception:
        return 1
    return 2 if ("v7" in kind or "tpu7" in kind) else 1


def _vmem_estimate(bb, t, hidden, state_dim, x_itemsize):
    """Approximate VMEM footprint for a chunk size t (per TensorCore block bb)."""
    ts = t * state_dim
    mix = ts * ts * 4 + state_dim * ts * 4                 # Toeplitz M + carry P
    io = 2 * bb * ts * 4 + 2 * bb * t * hidden * x_itemsize  # u + out, double-buffered
    weights = state_dim * hidden * x_itemsize              # C^T
    scratch = bb * state_dim * 4 + bb * ts * 4              # carry + chunk states
    temps = 2 * bb * ts * 4 + bb * max(hidden, 128) * 4     # s_flat value + y row
    return mix + io + weights + scratch + temps + (1 << 20)


def _choose_chunk(seq_len, bb, hidden, state_dim, x_itemsize,
                  max_chunk=64, vmem_budget=40 << 20):
    """Largest chunk that satisfies the (8,128) block rules and the VMEM budget
    (budget derived for the smallest-VMEM generation, v7x)."""
    need = 128 // math.gcd(state_dim, 128)                  # t*S % 128 == 0
    step = (8 * need) // math.gcd(8, need)                  # lcm(8, need)
    cap = max_chunk - (max_chunk % step) if max_chunk >= step else step
    fits = [t for t in range(step, cap + 1, step)
            if _vmem_estimate(bb, t, hidden, state_dim, x_itemsize) <= vmem_budget]
    if not fits:
        fits = [step]
    if seq_len <= fits[-1]:
        t_chunk = ((seq_len + step - 1) // step) * step     # single chunk
        return t_chunk, t_chunk
    divisors = [t for t in fits if seq_len % t == 0]
    t_chunk = divisors[-1] if divisors else fits[-1]
    padded = ((seq_len + t_chunk - 1) // t_chunk) * t_chunk
    return t_chunk, padded


def _build_scan_matrices(a_d, t_chunk):
    """Block-Toeplitz mixing matrix M and carry propagator P (plain JAX, tiny)."""
    s = a_d.shape[0]
    eye = jnp.eye(s, dtype=jnp.float32)

    def step(p, _):
        return p @ a_d, p

    # powers[k] = A_d^k, k = 0..t_chunk
    _, powers = jax.lax.scan(step, eye, None, length=t_chunk + 1)
    j_idx = jnp.arange(t_chunk)
    t_idx = jnp.arange(t_chunk)
    diff = t_idx[None, :] - j_idx[:, None]                  # (j, t)
    blocks = powers[jnp.clip(diff, 0, t_chunk)]             # (j, t, S, S)
    blocks = jnp.where((diff >= 0)[:, :, None, None], blocks, 0.0)
    # M[(j,s_in), (t,s_out)] = A_d^{t-j}[s_in, s_out] for t >= j, else 0
    m = jnp.transpose(blocks, (0, 2, 1, 3)).reshape(t_chunk * s, t_chunk * s)
    # P[s_in, (t,s_out)] = A_d^{t+1}[s_in, s_out]
    p = jnp.transpose(powers[1:], (1, 0, 2)).reshape(s, t_chunk * s)
    return m, p


def ssm_scan_pallas(x, a_discrete, b_discrete, c_mat, init_state):
    """x: (batch, seq, hidden). Returns (outputs (batch,seq,hidden) in x.dtype,
    final state (batch, state) f32)."""
    batch, seq_len, hidden = x.shape
    state_dim = a_discrete.shape[0]

    # 2-way batch split only on multi-TensorCore chips and only when each block
    # keeps the (8,128) rule satisfied.
    cores = _tensorcores_per_chip()
    num_batch_blocks = 2 if (cores >= 2 and batch % 16 == 0) else 1
    bb = batch // num_batch_blocks

    t_chunk, padded_seq = _choose_chunk(
        seq_len, bb, hidden, state_dim, x.dtype.itemsize)
    num_chunks = padded_seq // t_chunk
    tail_idx = None
    if padded_seq != seq_len:
        tail_idx = (seq_len - 1) - (num_chunks - 1) * t_chunk

    # Input projection (dense streaming matmul — left to XLA on purpose so the
    # kernel receives u already in the flat (bb, T*S) layout; bf16 x uses the
    # bf16 MXU path with f32 accumulation).
    u = jnp.einsum("bth,sh->bts", x, b_discrete.astype(x.dtype),
                   preferred_element_type=jnp.float32)
    if padded_seq != seq_len:
        u = jnp.pad(u, ((0, 0), (0, padded_seq - seq_len), (0, 0)))
    u_flat = u.reshape(batch, padded_seq * state_dim).astype(jnp.float32)

    m_mix, p_carry = _build_scan_matrices(a_discrete.astype(jnp.float32), t_chunk)
    ct = c_mat.T.astype(x.dtype)                            # (S, H)

    kernel = functools.partial(
        ssm_scan_kernel, t_chunk=t_chunk, state_dim=state_dim, tail_idx=tail_idx)

    est = _vmem_estimate(bb, t_chunk, hidden, state_dim, x.dtype.itemsize)
    vmem_limit = int(min(max(est * 3 // 2 + (8 << 20), 32 << 20), 128 << 20))

    ts = t_chunk * state_dim
    grid_spec = pltpu.PrefetchScalarGridSpec(
        num_scalar_prefetch=0,
        grid=(num_batch_blocks, num_chunks),
        in_specs=[
            pl.BlockSpec((bb, state_dim), lambda b, c: (b, 0)),     # init state
            pl.BlockSpec((bb, ts), lambda b, c: (b, c)),            # u chunk (flat)
            pl.BlockSpec((ts, ts), lambda b, c: (0, 0)),            # Toeplitz M
            pl.BlockSpec((state_dim, ts), lambda b, c: (0, 0)),     # carry prop P
            pl.BlockSpec((state_dim, hidden), lambda b, c: (0, 0)),  # C^T
        ],
        out_specs=[
            pl.BlockSpec((bb, t_chunk, hidden), lambda b, c: (b, c, 0)),  # outputs
            pl.BlockSpec((bb, state_dim), lambda b, c: (b, 0)),           # final state
        ],
        scratch_shapes=[
            pltpu.VMEM((bb, state_dim), jnp.float32),   # carried state
            pltpu.VMEM((bb, ts), jnp.float32),          # chunk states (flat, dense)
        ],
    )
    # NOTE: on v7x, if profiling shows exposed u DMAs, pipeline_mode=pl.Buffered(3)
    # on the u BlockSpec is the next lever; not enabled by default.

    outputs, final_state = pl.pallas_call(
        kernel,
        out_shape=(
            jax.ShapeDtypeStruct((batch, padded_seq, hidden), x.dtype),
            jax.ShapeDtypeStruct((batch, state_dim), jnp.float32),
        ),
        grid_spec=grid_spec,
        compiler_params=pltpu.CompilerParams(
            dimension_semantics=("parallel", "arbitrary"),
            vmem_limit_bytes=vmem_limit,
        ),
    )(init_state, u_flat, m_mix, p_carry, ct)

    if padded_seq != seq_len:
        outputs = outputs[:, :seq_len, :]
    return outputs, final_state


# ----------------------------------------------------------------------------
# Module-equivalent wrapper
# ----------------------------------------------------------------------------
def init_ssm_params(key, hidden_dim, state_dim=16, dt_min=0.001, dt_max=0.1):
    kA, kB, kC = jax.random.split(key, 3)
    A = 0.01 * jax.random.normal(kA, (state_dim, state_dim), jnp.float32)
    B = 0.01 * jax.random.normal(kB, (state_dim, hidden_dim), jnp.float32)
    C = 0.01 * jax.random.normal(kC, (hidden_dim, state_dim), jnp.float32)
    log_dt = jnp.linspace(math.log(dt_min), math.log(dt_max), hidden_dim,
                          dtype=jnp.float32)
    return {"A": A, "B": B, "C": C, "log_dt": log_dt}


def ssm_layer_forward(params, x, state=None):
    """x: (batch, seq, hidden). Returns (outputs, final_state) like SSMLayer.forward."""
    A, B, C, log_dt = params["A"], params["B"], params["C"], params["log_dt"]
    state_dim = A.shape[0]
    batch = x.shape[0]

    # TODO(synk): matrix_exp / inverse discretization has no Pallas equivalent;
    # it is tiny (state_dim x state_dim) and stays in plain JAX.
    dt = jnp.mean(jnp.exp(log_dt))
    A_discrete = jax.scipy.linalg.expm(A * dt)
    B_discrete = jnp.linalg.inv(A) @ ((A_discrete - jnp.eye(state_dim)) @ B)

    if state is None:
        init_state = jnp.zeros((batch, state_dim), jnp.float32)
    else:
        init_state = state.astype(jnp.float32)

    return ssm_scan_pallas(
        x,
        A_discrete.astype(jnp.float32),
        B_discrete.astype(jnp.float32),   # (state, hidden)
        C.astype(jnp.float32),            # (hidden, state)
        init_state,
    )


# ----------------------------------------------------------------------------
# Pure-JAX reference (mirrors the PyTorch loop) for sanity checks.
# ----------------------------------------------------------------------------
def ssm_layer_reference(params, x, state=None):
    A, B, C, log_dt = params["A"], params["B"], params["C"], params["log_dt"]
    state_dim = A.shape[0]
    batch = x.shape[0]
    dt = jnp.mean(jnp.exp(log_dt))
    A_d = jax.scipy.linalg.expm(A * dt)
    B_d = jnp.linalg.inv(A) @ ((A_d - jnp.eye(state_dim)) @ B)

    if state is None:
        state = jnp.zeros((batch, state_dim), jnp.float32)

    def step(s, x_t):
        s = s @ A_d + x_t @ B_d.T
        return s, s @ C.T

    final_state, outs = jax.lax.scan(step, state, jnp.swapaxes(x, 0, 1))
    return jnp.swapaxes(outs, 0, 1), final_state


def _check(got, ref, tol=2e-2):
    got = jax.block_until_ready(got)
    scale = jnp.max(jnp.abs(ref)) + 1e-12
    err = jnp.max(jnp.abs(got.astype(jnp.float32) - ref)) / scale
    assert float(err) < tol, f"normalized max error {float(err)} >= {tol}"


if __name__ == "__main__":
    batch, seq_len, hidden_dim, state_dim = 2, 8, 32, 16

    key = jax.random.PRNGKey(0)
    pkey, xkey, skey, xkey2 = jax.random.split(key, 4)
    params = init_ssm_params(pkey, hidden_dim, state_dim)
    x = jax.random.normal(xkey, (batch, seq_len, hidden_dim), jnp.float32)

    # zero initial state (default path)
    outputs, final_state = ssm_layer_forward(params, x)
    outputs = jax.block_until_ready(outputs)
    final_state = jax.block_until_ready(final_state)
    assert outputs.shape == (batch, seq_len, hidden_dim)
    assert final_state.shape == (batch, state_dim)
    ref_out, ref_state = ssm_layer_reference(params, x)
    _check(outputs, ref_out)
    _check(final_state, ref_state)

    # nonzero carried initial state
    state0 = 0.1 * jax.random.normal(skey, (batch, state_dim), jnp.float32)
    out2, fs2 = ssm_layer_forward(params, x, state=state0)
    ref_out2, ref_state2 = ssm_layer_reference(params, x, state=state0)
    _check(out2, ref_out2)
    _check(fs2, ref_state2)

    # longer, non-chunk-multiple sequence: exercises multi-chunk carry + tail path
    x_long = jax.random.normal(xkey2, (batch, 100, hidden_dim), jnp.float32)
    out3, fs3 = ssm_layer_forward(params, x_long, state=state0)
    ref_out3, ref_state3 = ssm_layer_reference(params, x_long, state=state0)
    _check(out3, ref_out3)
    _check(fs3, ref_state3)

    print("KERNEL_OK")
</pallas_src>

<mosaic_0001>
module attributes {stable_mosaic.version = 11 : i64} {
  func.func @ssm_scan_kernel(%arg0: i32, %arg1: i32, %arg2: memref<2x16xf32, #tpu.memory_space<vmem>>, %arg3: memref<2x128xf32, #tpu.memory_space<vmem>>, %arg4: memref<128x128xf32, #tpu.memory_space<vmem>>, %arg5: memref<16x128xf32, #tpu.memory_space<vmem>>, %arg6: memref<16x32xf32, #tpu.memory_space<vmem>>, %arg7: memref<2x8x32xf32, #tpu.memory_space<vmem>>, %arg8: memref<2x16xf32, #tpu.memory_space<vmem>>, %arg9: memref<2x16xf32, #tpu.memory_space<vmem>>, %arg10: memref<2x128xf32, #tpu.memory_space<vmem>>) attributes {dimension_semantics = [#tpu.dimension_semantics<parallel>, #tpu.dimension_semantics<arbitrary>], iteration_bounds = array<i64: 1, 1>, scalar_prefetch = 0 : i64, scratch_operands = 2 : i64, tpu.core_type = #tpu.core_type<tc>, window_params = [{transform_indices = @transform_0, window_bounds = array<i64: 2, 16>}, {transform_indices = @transform_1, window_bounds = array<i64: 2, 128>}, {pipeline_mode = #tpu.pipeline_mode<synchronous>, transform_indices = @transform_2, window_bounds = array<i64: 128, 128>}, {pipeline_mode = #tpu.pipeline_mode<synchronous>, transform_indices = @transform_3, window_bounds = array<i64: 16, 128>}, {pipeline_mode = #tpu.pipeline_mode<synchronous>, transform_indices = @transform_4, window_bounds = array<i64: 16, 32>}, {transform_indices = @transform_5, window_bounds = array<i64: 2, 8, 32>}, {transform_indices = @transform_6, window_bounds = array<i64: 2, 16>}]} {
    %c0_i32 = arith.constant 0 : i32
    %0 = arith.cmpi eq, %arg1, %c0_i32 : i32
    %1 = arith.extui %0 : i1 to i32
    %c0_i32_0 = arith.constant 0 : i32
    %2 = arith.cmpi ne, %1, %c0_i32_0 : i32
    scf.if %2 {
      %c0_53 = arith.constant 0 : index
      %c0_54 = arith.constant 0 : index
      %57 = vector.load %arg2[%c0_53, %c0_54] : memref<2x16xf32, #tpu.memory_space<vmem>>, vector<2x16xf32>
      %c0_55 = arith.constant 0 : index
      %c0_56 = arith.constant 0 : index
      %58 = vector.load %arg9[%c0_55, %c0_56] : memref<2x16xf32, #tpu.memory_space<vmem>>, vector<2x16xf32>
      tpu.vector_store %arg9[%c0_55, %c0_56], %57 {strides = array<i32>} : memref<2x16xf32, #tpu.memory_space<vmem>>, vector<2x16xf32>,
    } else {
    }
    %c0 = arith.constant 0 : index
    %c0_1 = arith.constant 0 : index
    %3 = vector.load %arg9[%c0, %c0_1] : memref<2x16xf32, #tpu.memory_space<vmem>>, vector<2x16xf32>
    %c0_2 = arith.constant 0 : index
    %c0_3 = arith.constant 0 : index
    %4 = vector.load %arg3[%c0_2, %c0_3] : memref<2x128xf32, #tpu.memory_space<vmem>>, vector<2x128xf32>
    %c0_4 = arith.constant 0 : index
    %c0_5 = arith.constant 0 : index
    %5 = vector.load %arg4[%c0_4, %c0_5] : memref<128x128xf32, #tpu.memory_space<vmem>>, vector<128x128xf32>
    %cst = arith.constant dense<0.000000e+00> : vector<2x128xf32>
    %6 = tpu.matmul %4, %5, %cst {dimension_numbers = #tpu.dot_dimension_numbers<[1], [0], [0], [1], [0, 0, 1, 1], [], []>} : vector<2x128xf32>, vector<128x128xf32>, vector<2x128xf32> -> vector<2x128xf32>
    %c0_6 = arith.constant 0 : index
    %c0_7 = arith.constant 0 : index
    %7 = vector.load %arg5[%c0_6, %c0_7] : memref<16x128xf32, #tpu.memory_space<vmem>>, vector<16x128xf32>
    %cst_8 = arith.constant dense<0.000000e+00> : vector<2x128xf32>
    %8 = tpu.matmul %3, %7, %cst_8 {dimension_numbers = #tpu.dot_dimension_numbers<[1], [0], [0], [1], [0, 0, 1, 1], [], []>} : vector<2x16xf32>, vector<16x128xf32>, vector<2x128xf32> -> vector<2x128xf32>
    %9 = arith.addf %6, %8 : vector<2x128xf32>
    %c0_9 = arith.constant 0 : index
    %c0_10 = arith.constant 0 : index
    %10 = vector.load %arg10[%c0_9, %c0_10] : memref<2x128xf32, #tpu.memory_space<vmem>>, vector<2x128xf32>
    tpu.vector_store %arg10[%c0_9, %c0_10], %9 {strides = array<i32>} : memref<2x128xf32, #tpu.memory_space<vmem>>, vector<2x128xf32>,
    %c0_11 = arith.constant 0 : index
    %c112 = arith.constant 112 : index
    %11 = vector.load %arg10[%c0_11, %c112] : memref<2x128xf32, #tpu.memory_space<vmem>>, vector<2x16xf32>
    %c0_12 = arith.constant 0 : index
    %c0_13 = arith.constant 0 : index
    %12 = vector.load %arg9[%c0_12, %c0_13] : memref<2x16xf32, #tpu.memory_space<vmem>>, vector<2x16xf32>
    tpu.vector_store %arg9[%c0_12, %c0_13], %11 {strides = array<i32>} : memref<2x16xf32, #tpu.memory_space<vmem>>, vector<2x16xf32>,
    %c0_14 = arith.constant 0 : index
    %c0_15 = arith.constant 0 : index
    %13 = vector.load %arg6[%c0_14, %c0_15] : memref<16x32xf32, #tpu.memory_space<vmem>>, vector<16x32xf32>
    %c0_16 = arith.constant 0 : index
    %c0_17 = arith.constant 0 : index
    %14 = vector.load %arg10[%c0_16, %c0_17] : memref<2x128xf32, #tpu.memory_space<vmem>>, vector<2x16xf32>
    %cst_18 = arith.constant dense<0.000000e+00> : vector<2x32xf32>
    %15 = tpu.matmul %14, %13, %cst_18 {dimension_numbers = #tpu.dot_dimension_numbers<[1], [0], [0], [1], [0, 0, 1, 1], [], []>} : vector<2x16xf32>, vector<16x32xf32>, vector<2x32xf32> -> vector<2x32xf32>
    %c0_19 = arith.constant 0 : index
    %c0_20 = arith.constant 0 : index
    %c0_21 = arith.constant 0 : index
    %16 = vector.load %arg7[%c0_19, %c0_20, %c0_21] : memref<2x8x32xf32, #tpu.memory_space<vmem>>, vector<2x1x32xf32>
    %17 = vector.shape_cast %16 : vector<2x1x32xf32> to vector<2x32xf32>
    %18 = vector.shape_cast %15 : vector<2x32xf32> to vector<2x1x32xf32>
    tpu.vector_store %arg7[%c0_19, %c0_20, %c0_21], %18 {strides = array<i32>} : memref<2x8x32xf32, #tpu.memory_space<vmem>>, vector<2x1x32xf32>,
    %c0_22 = arith.constant 0 : index
    %c16 = arith.constant 16 : index
    %19 = vector.load %arg10[%c0_22, %c16] : memref<2x128xf32, #tpu.memory_space<vmem>>, vector<2x16xf32>
    %cst_23 = arith.constant dense<0.000000e+00> : vector<2x32xf32>
    %20 = tpu.matmul %19, %13, %cst_23 {dimension_numbers = #tpu.dot_dimension_numbers<[1], [0], [0], [1], [0, 0, 1, 1], [], []>} : vector<2x16xf32>, vector<16x32xf32>, vector<2x32xf32> -> vector<2x32xf32>
    %c0_24 = arith.constant 0 : index
    %c1 = arith.constant 1 : index
    %c0_25 = arith.constant 0 : index
    %21 = vector.load %arg7[%c0_24, %c1, %c0_25] : memref<2x8x32xf32, #tpu.memory_space<vmem>>, vector<2x1x32xf32>
    %22 = vector.shape_cast %21 : vector<2x1x32xf32> to vector<2x32xf32>
    %23 = vector.shape_cast %20 : vector<2x32xf32> to vector<2x1x32xf32>
    tpu.vector_store %arg7[%c0_24, %c1, %c0_25], %23 {strides = array<i32>} : memref<2x8x32xf32, #tpu.memory_space<vmem>>, vector<2x1x32xf32>,
    %c0_26 = arith.constant 0 : index
    %c32 = arith.constant 32 : index
    %24 = vector.load %arg10[%c0_26, %c32] : memref<2x128xf32, #tpu.memory_space<vmem>>, vector<2x16xf32>
    %cst_27 = arith.constant dense<0.000000e+00> : vector<2x32xf32>
    %25 = tpu.matmul %24, %13, %cst_27 {dimension_numbers = #tpu.dot_dimension_numbers<[1], [0], [0], [1], [0, 0, 1, 1], [], []>} : vector<2x16xf32>, vector<16x32xf32>, vector<2x32xf32> -> vector<2x32xf32>
    %c0_28 = arith.constant 0 : index
    %c2 = arith.constant 2 : index
    %c0_29 = arith.constant 0 : index
    %26 = vector.load %arg7[%c0_28, %c2, %c0_29] : memref<2x8x32xf32, #tpu.memory_space<vmem>>, vector<2x1x32xf32>
    %27 = vector.shape_cast %26 : vector<2x1x32xf32> to vector<2x32xf32>
    %28 = vector.shape_cast %25 : vector<2x32xf32> to vector<2x1x32xf32>
    tpu.vector_store %arg7[%c0_28, %c2, %c0_29], %28 {strides = array<i32>} : memref<2x8x32xf32, #tpu.memory_space<vmem>>, vector<2x1x32xf32>,
    %c0_30 = arith.constant 0 : index
    %c48 = arith.constant 48 : index
    %29 = vector.load %arg10[%c0_30, %c48] : memref<2x128xf32, #tpu.memory_space<vmem>>, vector<2x16xf32>
    %cst_31 = arith.constant dense<0.000000e+00> : vector<2x32xf32>
    %30 = tpu.matmul %29, %13, %cst_31 {dimension_numbers = #tpu.dot_dimension_numbers<[1], [0], [0], [1], [0, 0, 1, 1], [], []>} : vector<2x16xf32>, vector<16x32xf32>, vector<2x32xf32> -> vector<2x32xf32>
    %c0_32 = arith.constant 0 : index
    %c3 = arith.constant 3 : index
    %c0_33 = arith.constant 0 : index
    %31 = vector.load %arg7[%c0_32, %c3, %c0_33] : memref<2x8x32xf32, #tpu.memory_space<vmem>>, vector<2x1x32xf32>
    %32 = vector.shape_cast %31 : vector<2x1x32xf32> to vector<2x32xf32>
    %33 = vector.shape_cast %30 : vector<2x32xf32> to vector<2x1x32xf32>
    tpu.vector_store %arg7[%c0_32, %c3, %c0_33], %33 {strides = array<i32>} : memref<2x8x32xf32, #tpu.memory_space<vmem>>, vector<2x1x32xf32>,
    %c0_34 = arith.constant 0 : index
    %c64 = arith.constant 64 : index
    %34 = vector.load %arg10[%c0_34, %c64] : memref<2x128xf32, #tpu.memory_space<vmem>>, vector<2x16xf32>
    %cst_35 = arith.constant dense<0.000000e+00> : vector<2x32xf32>
    %35 = tpu.matmul %34, %13, %cst_35 {dimension_numbers = #tpu.dot_dimension_numbers<[1], [0], [0], [1], [0, 0, 1, 1], [], []>} : vector<2x16xf32>, vector<16x32xf32>, vector<2x32xf32> -> vector<2x32xf32>
    %c0_36 = arith.constant 0 : index
    %c4 = arith.constant 4 : index
    %c0_37 = arith.constant 0 : index
    %36 = vector.load %arg7[%c0_36, %c4, %c0_37] : memref<2x8x32xf32, #tpu.memory_space<vmem>>, vector<2x1x32xf32>
    %37 = vector.shape_cast %36 : vector<2x1x32xf32> to vector<2x32xf32>
    %38 = vector.shape_cast %35 : vector<2x32xf32> to vector<2x1x32xf32>
    tpu.vector_store %arg7[%c0_36, %c4, %c0_37], %38 {strides = array<i32>} : memref<2x8x32xf32, #tpu.memory_space<vmem>>, vector<2x1x32xf32>,
    %c0_38 = arith.constant 0 : index
    %c80 = arith.constant 80 : index
    %39 = vector.load %arg10[%c0_38, %c80] : memref<2x128xf32, #tpu.memory_space<vmem>>, vector<2x16xf32>
    %cst_39 = arith.constant dense<0.000000e+00> : vector<2x32xf32>
    %40 = tpu.matmul %39, %13, %cst_39 {dimension_numbers = #tpu.dot_dimension_numbers<[1], [0], [0], [1], [0, 0, 1, 1], [], []>} : vector<2x16xf32>, vector<16x32xf32>, vector<2x32xf32> -> vector<2x32xf32>
    %c0_40 = arith.constant 0 : index
    %c5 = arith.constant 5 : index
    %c0_41 = arith.constant 0 : index
    %41 = vector.load %arg7[%c0_40, %c5, %c0_41] : memref<2x8x32xf32, #tpu.memory_space<vmem>>, vector<2x1x32xf32>
    %42 = vector.shape_cast %41 : vector<2x1x32xf32> to vector<2x32xf32>
    %43 = vector.shape_cast %40 : vector<2x32xf32> to vector<2x1x32xf32>
    tpu.vector_store %arg7[%c0_40, %c5, %c0_41], %43 {strides = array<i32>} : memref<2x8x32xf32, #tpu.memory_space<vmem>>, vector<2x1x32xf32>,
    %c0_42 = arith.constant 0 : index
    %c96 = arith.constant 96 : index
    %44 = vector.load %arg10[%c0_42, %c96] : memref<2x128xf32, #tpu.memory_space<vmem>>, vector<2x16xf32>
    %cst_43 = arith.constant dense<0.000000e+00> : vector<2x32xf32>
    %45 = tpu.matmul %44, %13, %cst_43 {dimension_numbers = #tpu.dot_dimension_numbers<[1], [0], [0], [1], [0, 0, 1, 1], [], []>} : vector<2x16xf32>, vector<16x32xf32>, vector<2x32xf32> -> vector<2x32xf32>
    %c0_44 = arith.constant 0 : index
    %c6 = arith.constant 6 : index
    %c0_45 = arith.constant 0 : index
    %46 = vector.load %arg7[%c0_44, %c6, %c0_45] : memref<2x8x32xf32, #tpu.memory_space<vmem>>, vector<2x1x32xf32>
    %47 = vector.shape_cast %46 : vector<2x1x32xf32> to vector<2x32xf32>
    %48 = vector.shape_cast %45 : vector<2x32xf32> to vector<2x1x32xf32>
    tpu.vector_store %arg7[%c0_44, %c6, %c0_45], %48 {strides = array<i32>} : memref<2x8x32xf32, #tpu.memory_space<vmem>>, vector<2x1x32xf32>,
    %c0_46 = arith.constant 0 : index
    %c112_47 = arith.constant 112 : index
    %49 = vector.load %arg10[%c0_46, %c112_47] : memref<2x128xf32, #tpu.memory_space<vmem>>, vector<2x16xf32>
    %cst_48 = arith.constant dense<0.000000e+00> : vector<2x32xf32>
    %50 = tpu.matmul %49, %13, %cst_48 {dimension_numbers = #tpu.dot_dimension_numbers<[1], [0], [0], [1], [0, 0, 1, 1], [], []>} : vector<2x16xf32>, vector<16x32xf32>, vector<2x32xf32> -> vector<2x32xf32>
    %c0_49 = arith.constant 0 : index
    %c7 = arith.constant 7 : index
    %c0_50 = arith.constant 0 : index
    %51 = vector.load %arg7[%c0_49, %c7, %c0_50] : memref<2x8x32xf32, #tpu.memory_space<vmem>>, vector<2x1x32xf32>
    %52 = vector.shape_cast %51 : vector<2x1x32xf32> to vector<2x32xf32>
    %53 = vector.shape_cast %50 : vector<2x32xf32> to vector<2x1x32xf32>
    tpu.vector_store %arg7[%c0_49, %c7, %c0_50], %53 {strides = array<i32>} : memref<2x8x32xf32, #tpu.memory_space<vmem>>, vector<2x1x32xf32>,
    %c0_i32_51 = arith.constant 0 : i32
    %54 = arith.cmpi eq, %arg1, %c0_i32_51 : i32
    %55 = arith.extui %54 : i1 to i32
    %c0_i32_52 = arith.constant 0 : i32
    %56 = arith.cmpi ne, %55, %c0_i32_52 : i32
    scf.if %56 {
      %c0_53 = arith.constant 0 : index
      %c0_54 = arith.constant 0 : index
      %57 = vector.load %arg9[%c0_53, %c0_54] : memref<2x16xf32, #tpu.memory_space<vmem>>, vector<2x16xf32>
      %c0_55 = arith.constant 0 : index
      %c0_56 = arith.constant 0 : index
      %58 = vector.load %arg8[%c0_55, %c0_56] : memref<2x16xf32, #tpu.memory_space<vmem>>, vector<2x16xf32>
      tpu.vector_store %arg8[%c0_55, %c0_56], %57 {strides = array<i32>} : memref<2x16xf32, #tpu.memory_space<vmem>>, vector<2x16xf32>,
    } else {
    }
    return
  }
  func.func @transform_0(%arg0: i32, %arg1: i32) -> (i32, i32) {
    %c0_i32 = arith.constant 0 : i32
    %c0_i32_0 = arith.constant 0 : i32
    return %arg0, %c0_i32 : i32, i32
  }
  func.func @transform_1(%arg0: i32, %arg1: i32) -> (i32, i32) {
    %c0_i32 = arith.constant 0 : i32
    return %arg0, %arg1 : i32, i32
  }
  func.func @transform_2(%arg0: i32, %arg1: i32) -> (i32, i32) {
    %c0_i32 = arith.constant 0 : i32
    %c0_i32_0 = arith.constant 0 : i32
    %c0_i32_1 = arith.constant 0 : i32
    return %c0_i32, %c0_i32_0 : i32, i32
  }
  func.func @transform_3(%arg0: i32, %arg1: i32) -> (i32, i32) {
    %c0_i32 = arith.constant 0 : i32
    %c0_i32_0 = arith.constant 0 : i32
    %c0_i32_1 = arith.constant 0 : i32
    return %c0_i32, %c0_i32_0 : i32, i32
  }
  func.func @transform_4(%arg0: i32, %arg1: i32) -> (i32, i32) {
    %c0_i32 = arith.constant 0 : i32
    %c0_i32_0 = arith.constant 0 : i32
    %c0_i32_1 = arith.constant 0 : i32
    return %c0_i32, %c0_i32_0 : i32, i32
  }
  func.func @transform_5(%arg0: i32, %arg1: i32) -> (i32, i32, i32) {
    %c0_i32 = arith.constant 0 : i32
    %c0_i32_0 = arith.constant 0 : i32
    return %arg0, %arg1, %c0_i32 : i32, i32, i32
  }
  func.func @transform_6(%arg0: i32, %arg1: i32) -> (i32, i32) {
    %c0_i32 = arith.constant 0 : i32
    %c0_i32_0 = arith.constant 0 : i32
    return %arg0, %c0_i32 : i32, i32
  }
}

</mosaic_0001>

<bundles_post_ra>
// kernel: tpu_custom_call.1
= control target key start
LH: loop header
LB: loop body
LE: loop exit
PB: predicated region body
PF: predicated region fallthrough
CT: control target
= control target key end

     0   :  { %12 = vsyncpa [#allocation5], 0  ;;  %s783_s0 = inlined_call_operand.hbm [shape: f32[2,16], index: 0, kind: input, shape index: {}]   ;;  %s784_s1 = inlined_call_operand.hbm [shape: f32[2,128], index: 1, kind: input, shape index: {}]   ;;  %s785_s2 = inlined_call_operand.hbm [shape: f32[128,128], index: 2, kind: input, shape index: {}]   ;;  %s786_s3 = inlined_call_operand.hbm [shape: f32[16,128], index: 3, kind: input, shape index: {}]   ;;  %s787_s4 = inlined_call_operand.hbm [shape: f32[16,32], index: 4, kind: input, shape index: {}]   ;;  %s788_s5 = inlined_call_operand.hbm [shape: f32[2,8,32], index: 5, kind: output, shape index: {0}]   ;;  %s789_s6 = inlined_call_operand.hbm [shape: f32[2,16], index: 6, kind: output, shape index: {1}]  }
   0x1   :  { %13 = vsyncpa [#allocation8], 0 }
   0x2   :  { %14 = vsyncpa [#allocation11], 0 }
   0x3   :  { %15 = vsyncpa [#allocation6], 0  ;;  %s33_s23 = sshll.u32 %s784_s1, 4  ;;  %s34_s23 = int_to_ptr.hbm [resolvable:$true] %s33_s23 }
   0x4   :  { %16 = vsyncpa [#allocation15], 0  ;;  %s671_s24 = smov [#allocation7]   ;;  %s56_s28 = sshll.u32 %s786_s3, 4  ;;  %s57_s28 = int_to_ptr.hbm [resolvable:$true] %s56_s28 }
   0x5   :  { %s35_s25 = sshll.u32 %s671_s24, 4  ;;  %s672_s29 = smov [#allocation10]   ;;  %s36_s25 = int_to_ptr.vmem [resolvable:$true] %s35_s25 }
   0x6   :  { %38 = dma.hbm_to_vmem [thread:$0]  %s34_s23, 32, %s36_s25, [#allocation8]  }
   0x7   :  { %s58_s30 = sshll.u32 %s672_s29, 4  ;;  %s22_s9 = sshll.u32 %s783_s0, 4  ;;  %s59_s30 = int_to_ptr.vmem [resolvable:$true] %s58_s30  ;;  %s23_s9 = int_to_ptr.hbm [resolvable:$true] %s22_s9 }
   0x8   :  { %s673_s1 = smov 128   ;;  %s674_s10 = smov 8  }
   0x9   :  { %64 = dma.hbm_to_vmem [thread:$0]  %s57_s28, 256, %s59_s30, [#allocation11], %s673_s1, %s673_s1, %s674_s10  }
   0xa   :  { %s43_s13 = sshll.u32 %s785_s2, 4  ;;  %s675_s3 = smov [#allocation4]   ;;  %s44_s13 = int_to_ptr.hbm [resolvable:$true] %s43_s13 }
   0xb   :  { %s24_s14 = sshll.u32 %s675_s3, 4  ;;  %s676_s15 = smov [#allocation9]   ;;  %s25_s14 = int_to_ptr.vmem [resolvable:$true] %s24_s14 }
   0xc   :  { %27 = dma.hbm_to_vmem [thread:$0]  %s23_s9, 32, %s25_s14, [#allocation5]  }
   0xd   :  { %s45_s16 = sshll.u32 %s676_s15, 4  ;;  %s69_s18 = sshll.u32 %s787_s4, 4  ;;  %s46_s16 = int_to_ptr.vmem [resolvable:$true] %s45_s16  ;;  %s70_s18 = int_to_ptr.hbm [resolvable:$true] %s69_s18 }
   0xe   :  { %51 = dma.hbm_to_vmem [thread:$0]  %s44_s13, 2048, %s46_s16, [#allocation8], %s673_s1, %s673_s1, %s674_s10  }
   0xf   :  { %s677_s19 = smov [#allocation12]  }
  0x10   :  { %s71_s20 = sshll.u32 %s677_s19, 4  ;;  %s72_s20 = int_to_ptr.vmem [resolvable:$true] %s71_s20 }
  0x11   :  { %77 = dma.hbm_to_vmem [thread:$0]  %s70_s18, 256, %s72_s20, [#allocation11], %s673_s1, %s673_s1, %s674_s10  }
  0x12   :  { %661 = dma.done.wait [#allocation5], 32  }
  0x13   :  { %662 = vsyncadd [#allocation5], 4294967264 }
  0x14   :  { %663 = dma.done.wait [#allocation8], 2080  }
  0x15   :  { %664 = vsyncadd [#allocation8], 4294965216 }
  0x16   :  { %665 = dma.done.wait [#allocation11], 512  }
  0x17   :  { %666 = vsyncadd [#allocation11], 4294966784  ;;  %v122_v0 = vld [vmem:[#allocation9 + $0x78] sm:$0xff]  ;;  %v121_v1 = vld [vmem:[#allocation9 + $0x70] sm:$0xff]  ;;  %vm103_vm0 = vcmask 123904   ;;  %vm125_vm1 = vcmask 130048  }
  0x18   :  { %149 = vmatpush.msra.mxu1 %v122_v0  ;;  %v120_v2 = vld [vmem:[#allocation9 + $0x68] sm:$0xff]  ;;  %v119_v3 = vld [vmem:[#allocation9 + $0x60] sm:$0xff]  ;;  %v118_v6 = vld [vmem:[#allocation9 + $0x58] sm:$0xff]  ;;  %s678_s2 = smov 32   ;;  %s679_s4 = smov 64   ;;  %vm206_vm2 = vcmask 253952  }
  0x19   :  { %v124_v4 = vld [vmem:[#allocation10 + $0x8] sm:$0xff]  ;;  %v123_v5 = vld [vmem:[#allocation10] sm:$0xff]  ;;  %v102_v7 = vld [vmem:[#allocation4] sm:$0x3]  ;;  %s680_s21 = smov 112   ;;  %s681_s22 = smov 16  }
  0x1a   :  { %150 = vmatpush.msra.mxu1 %v121_v1  ;;  %143 = vmatpush.msra.mxu0 %v124_v4  ;;  %104 = vst.msk [vmem:[#allocation2] sm:$0x3] %vm103_vm0, %v102_v7  ;;  %v117_v8 = vld [vmem:[#allocation9 + $0x50] sm:$0xff]  ;;  %v116_v9 = vld [vmem:[#allocation9 + $0x48] sm:$0xff]  ;;  %v115_v10 = vld [vmem:[#allocation9 + $0x40] sm:$0xff]  ;;  %s682_s23 = smov 96  }
  0x1b   :  { %v114_v11 = vld [vmem:[#allocation9 + $0x38] sm:$0xff]  ;;  %v113_v13 = vld [vmem:[#allocation9 + $0x30] sm:$0xff]  ;;  %v112_v14 = vld [vmem:[#allocation9 + $0x28] sm:$0xff]  ;;  %s683_s24 = smov 80   ;;  %s684_s25 = smov 48  }
  0x1c   :  { %151 = vmatpush.msra.mxu1 %v120_v2  ;;  %144 = vmatpush.msra.mxu0 %v123_v5  ;;  %v111_v15 = vld [vmem:[#allocation9 + $0x20] sm:$0xff]  ;;  %v110_v16 = vld [vmem:[#allocation9 + $0x18] sm:$0xff]  ;;  %v109_v17 = vld [vmem:[#allocation9 + $0x10] sm:$0xff]  ;;  %s685_s26 = smov [#allocation14]   ;;  %s451_s30 = sshll.u32 %s789_s6, 4  ;;  %s452_s30 = int_to_ptr.hbm [resolvable:$true] %s451_s30 }
  0x1d   :  { %v108_v18 = vld [vmem:[#allocation9 + $0x8] sm:$0xff]  ;;  %v107_v19 = vld [vmem:[#allocation9] sm:$0xff]  ;;  %v106_v20 = vld [vmem:[#allocation7] sm:$0x3]  ;;  %s449_s27 = sshll.u32 %s685_s26, 4  ;;  %s686_s6 = smov [#allocation13]   ;;  %s450_s27 = int_to_ptr.vmem [resolvable:$true] %s449_s27 }
  0x1e   :  { %152 = vmatpush.msra.mxu1 %v119_v3  ;;  %v178_v21 = vld [vmem:[#allocation12 + $0x8] sm:$0xff]  ;;  %v177_v22 = vld [vmem:[#allocation12] sm:$0xff]  ;;  %s435_s7 = sshll.u32 %s686_s6, 4  ;;  %s437_s11 = sshll.u32 %s788_s5, 4  ;;  %s436_s7 = int_to_ptr.vmem [resolvable:$true] %s435_s7  ;;  %s438_s11 = int_to_ptr.hbm [resolvable:$true] %s437_s11 }
  0x1f   :  { %197 = vmatpush.msra.mxu2 %v178_v21  ;;  %229 = vmatpush.msra.mxu3 %v178_v21 }
  0x20   :  { %153 = vmatpush.msra.mxu1 %v118_v6  ;;  %260 = vmatpush.msrb.mxu0 %v178_v21 }
  0x21   :  { %v105_v12 = vld [vmem:[#allocation2] sm:$0x3]  ;;  %198 = vmatpush.msra.mxu2 %v177_v22  ;;  %230 = vmatpush.msra.mxu3 %v177_v22 }
  0x22   :  { %154 = vmatpush.msra.mxu1 %v117_v8  ;;  %468 = vmatmul.msk.f32.vlgmr.msra.gmra.mxu0 %vm125_vm1, %v105_v12 }
  0x23   :  { %291 = vmatpush.msrb.mxu2 %v178_v21  ;;  %322 = vmatpush.msrb.mxu3 %v178_v21 }
  0x24   :  { %155 = vmatpush.msra.mxu1 %v116_v9  ;;  %261 = vmatpush.msrb.mxu0 %v177_v22 }
  0x25   :  { %292 = vmatpush.msrb.mxu2 %v177_v22  ;;  %323 = vmatpush.msrb.mxu3 %v177_v22 }
  0x26   :  { %156 = vmatpush.msra.mxu1 %v115_v10  ;;  %353 = vmatpush.msra.mxu0 %v178_v21 }
  0x28   :  { %157 = vmatpush.msra.mxu1 %v114_v11  ;;  %354 = vmatpush.msra.mxu0 %v177_v22 }
  0x2a   :  { %158 = vmatpush.msra.mxu1 %v113_v13 }
  0x2c   :  { %159 = vmatpush.msra.mxu1 %v112_v14 }
  0x2e   :  { %160 = vmatpush.msra.mxu1 %v111_v15 }
  0x30   :  { %161 = vmatpush.msra.mxu1 %v110_v16 }
  0x32   :  { %162 = vmatpush.msra.mxu1 %v109_v17 }
  0x34   :  { %163 = vmatpush.msra.mxu1 %v108_v18 }
  0x36   :  { %164 = vmatpush.msra.mxu1 %v107_v19 }
  0x37   :  { %165 = vmatmul.f32.vlgmr.msra.gmra.mxu1 %v106_v20 }
  0x9f   :  { %v146_v23 = vpop.f32.mrf.mxu0 }
  0xb4   :  { %v166_v24 = vpop.f32.mrf.mxu1 }
  0xb5   :  { %v167_v25 = vadd.f32 %v166_v24, %v146_v23 }
  0xb7   :  { %169 = vst [vmem:[#allocation3] sm:$0x3] %v167_v25 }
  0xbe   :  { %v364_v26 = vld [vmem:[#allocation3] sm:$0x3] }
  0xbf   :  { %v302_v27 = vld [vmem:[#allocation3] sm:$0x3]  ;;  %366 = vrot.lane.b32.xlu2 %v364_v26, %s678_s2 }
  0xc0   :  { %v209_v28 = vld [vmem:[#allocation3] sm:$0x3]  ;;  %304 = vrot.lane.b32.xlu1 %v302_v27, %s679_s4 }
  0xc1   :  { %v179_v29 = vld [vmem:[#allocation3] sm:$0x3]  ;;  %211 = vrot.lane.b32.xlu0 %v209_v28, %s680_s21 }
  0xc2   :  { %469 = vmatmul.msk.f32.vlgmr.msra.gmra.mxu2 %vm125_vm1, %v179_v29  ;;  %v395_v30 = vld [vmem:[#allocation3] sm:$0x3] }
  0xc3   :  { %384 = vmatpush.msra.mxu2 %v178_v21  ;;  %v240_v31 = vld [vmem:[#allocation3] sm:$0x3] }
  0xc4   :  { %v271_v32 = vld [vmem:[#allocation3] sm:$0x3] }
  0xc5   :  { %385 = vmatpush.msra.mxu2 %v177_v22  ;;  %v170_v33 = vld [vmem:[#allocation3] sm:$0x3] }
  0xc6   :  { %v333_v34 = vld [vmem:[#allocation3] sm:$0x3] }
  0xc7   :  { %397 = vrot.lane.b32.xlu2 %v395_v30, %s681_s22 }
  0xc8   :  { %242 = vrot.lane.b32.xlu1 %v240_v31, %s682_s23 }
  0xc9   :  { %273 = vrot.lane.b32.xlu0 %v271_v32, %s683_s24 }
  0xd0   :  { %172 = vrot.lane.b32.xlu1 %v170_v33, %s681_s22 }
  0xd1   :  { %335 = vrot.lane.b32.xlu0 %v333_v34, %s684_s25 }
 0x119   :  { %v367_v37 = vpop.permute.xlu2 %366 }
 0x121   :  { %v398_v42 = vpop.permute.xlu2 %397 }
 0x132   :  { %v305_v35 = vpop.permute.xlu1 %304 }
 0x133   :  { %v212_v36 = vpop.permute.xlu0 %211 }
 0x134   :  { %470 = vmatmul.msk.f32.vlgmr.msra.gmra.mxu3 %vm125_vm1, %v212_v36 }
 0x135   :  { %415 = vmatpush.msra.mxu3 %v178_v21 }
 0x137   :  { %416 = vmatpush.msra.mxu3 %v177_v22 }
 0x13a   :  { %v243_v38 = vpop.permute.xlu1 %242 }
 0x13b   :  { %v274_v39 = vpop.permute.xlu0 %273  ;;  %471 = vmatmul.msk.f32.vlgmr.msrb.gmra.mxu0 %vm125_vm1, %v243_v38 }
 0x13c   :  { %472 = vmatmul.msk.f32.vlgmr.msrb.gmra.mxu2 %vm125_vm1, %v274_v39  ;;  %473 = vmatmul.msk.f32.vlgmr.msrb.gmra.mxu3 %vm125_vm1, %v305_v35 }
 0x142   :  { %v173_v40 = vpop.permute.xlu1 %172 }
 0x143   :  { %v336_v41 = vpop.permute.xlu0 %335  ;;  %176 = vst.msk [vmem:[#allocation2] sm:$0x3] %vm103_vm0, %v173_v40 }
 0x144   :  { %474 = vmatmul.msk.f32.vlgmr.msra.gmra.mxu0 %vm125_vm1, %v336_v41  ;;  %475 = vmatmul.msk.f32.vlgmr.msra.gmra.mxu2 %vm125_vm1, %v367_v37 }
 0x145   :  { %v200_v43 = vpop.f32.mrf.mxu2  ;;  %476 = vmatmul.msk.f32.vlgmr.msra.gmra.mxu3 %vm125_vm1, %v398_v42 }
 0x146   :  { %v204_v44 = vrot.slane %v200_v43, 1  ;;  %207 = vst.msk [vmem:[#allocation13] sm:$0x1] %vm206_vm2, %v200_v43 }
 0x148   :  { %208 = vst.msk [vmem:[#allocation13 + $0x8] sm:$0x1] %vm206_vm2, %v204_v44 }
 0x14a   :  { %v429_v45 = vld [vmem:[#allocation2] sm:$0x3] }
 0x14b   :  { %430 = vst.msk [vmem:[#allocation14] sm:$0x3] %vm103_vm0, %v429_v45 }
 0x14c   :  { %454 = dma.vmem_to_hbm [thread:$0]  %s450_s27, 32, %s452_s30, [#allocation15]  }
 0x1b7   :  { %v232_v46 = vpop.f32.mrf.mxu3 }
 0x1b8   :  { %v236_v47 = vrot.slane %v232_v46, 1  ;;  %238 = vst.msk [vmem:[#allocation13 + $0x1] sm:$0x1] %vm206_vm2, %v232_v46  ;;  %v263_v48 = vpop.f32.mrf.mxu0 }
 0x1b9   :  { %v267_v49 = vrot.slane %v263_v48, 1  ;;  %269 = vst.msk [vmem:[#allocation13 + $0x2] sm:$0x1] %vm206_vm2, %v263_v48 }
 0x1ba   :  { %239 = vst.msk [vmem:[#allocation13 + $0x9] sm:$0x1] %vm206_vm2, %v236_v47 }
 0x1bb   :  { %270 = vst.msk [vmem:[#allocation13 + $0xa] sm:$0x1] %vm206_vm2, %v267_v49 }
 0x1bf   :  { %v294_v50 = vpop.f32.mrf.mxu2  ;;  %v325_v51 = vpop.f32.mrf.mxu3 }
 0x1c0   :  { %v298_v52 = vrot.slane %v294_v50, 1  ;;  %300 = vst.msk [vmem:[#allocation13 + $0x3] sm:$0x1] %vm206_vm2, %v294_v50  ;;  %v329_v53 = vrot.slane %v325_v51, 1 }
 0x1c1   :  { %331 = vst.msk [vmem:[#allocation13 + $0x4] sm:$0x1] %vm206_vm2, %v325_v51  ;;  %v356_v54 = vpop.f32.mrf.mxu0 }
 0x1c2   :  { %301 = vst.msk [vmem:[#allocation13 + $0xb] sm:$0x1] %vm206_vm2, %v298_v52  ;;  %v360_v55 = vrot.slane %v356_v54, 1 }
 0x1c3   :  { %332 = vst.msk [vmem:[#allocation13 + $0xc] sm:$0x1] %vm206_vm2, %v329_v53 }
 0x1c4   :  { %362 = vst.msk [vmem:[#allocation13 + $0x5] sm:$0x1] %vm206_vm2, %v356_v54 }
 0x1c5   :  { %363 = vst.msk [vmem:[#allocation13 + $0xd] sm:$0x1] %vm206_vm2, %v360_v55 }
 0x1c7   :  { %v387_v56 = vpop.f32.mrf.mxu2 }
 0x1c8   :  { %v391_v57 = vrot.slane %v387_v56, 1  ;;  %393 = vst.msk [vmem:[#allocation13 + $0x6] sm:$0x1] %vm206_vm2, %v387_v56  ;;  %v418_v58 = vpop.f32.mrf.mxu3 }
 0x1c9   :  { %v422_v59 = vrot.slane %v418_v58, 1  ;;  %424 = vst.msk [vmem:[#allocation13 + $0x7] sm:$0x1] %vm206_vm2, %v418_v58 }
 0x1ca   :  { %394 = vst.msk [vmem:[#allocation13 + $0xe] sm:$0x1] %vm206_vm2, %v391_v57 }
 0x1cb   :  { %425 = vst.msk [vmem:[#allocation13 + $0xf] sm:$0x1] %vm206_vm2, %v422_v59 }
 0x1cc   :  { %443 = dma.vmem_to_hbm [thread:$0]  %s436_s7, 256, %s438_s11, [#allocation6], %s673_s1, %s673_s1, %s674_s10  }
 0x1cd   :  { %667 = dma.done.wait [#allocation6], 256  }
 0x1ce   :  { %668 = vsyncadd [#allocation6], 4294967040 }
 0x1cf   :  { %669 = dma.done.wait [#allocation15], 32  }
 0x1d0   :  { %670 = vsyncadd [#allocation15], 4294967264 }
 0x1d1   :  { %463 = vsyncpa [#allocation5], 1 }
 0x1d2   :  { %464 = vsyncpa [#allocation8], 1 }
 0x1d3   :  { %465 = vsyncpa [#allocation11], 1 }
 0x1d4   :  { %466 = vsyncpa [#allocation6], 1 }
 0x1d5   :  { %467 = vsyncpa [#allocation15], 1 }

</bundles_post_ra>
